<compile_context>
chip_gen: v5e
topology: v5e:2x2
jax: 0.10.0
libtpu: 0.0.40
codegen_flags: <defaults>
</compile_context>

<pallas_src>
import jax
import jax.numpy as jnp
from jax.experimental import pallas as pl
from jax.experimental.pallas import tpu as pltpu


def _itemsize(dtype):
    return jnp.dtype(dtype).itemsize


def _spatial_tile(S, C, itemsize, target_bytes):
    """Largest multiple-of-128 spatial tile whose (C, tile) block is ~target_bytes,
    clamped to <= S.  Full extent when S <= 128 (block == full dim is legal)."""
    if S <= 128:
        return int(S)
    ts = (target_bytes // max(C * itemsize, 1)) // 128 * 128
    ts = max(128, min(ts, (S // 128) * 128))
    return int(ts)


def _vmem_limit(buffer_bytes, extra_bytes=0):
    """Explicit VMEM budget: what we actually use plus headroom, clamped to
    48 MiB so it is safe on v7x (64 MiB physical) as well as v5e/v6e."""
    need = int(buffer_bytes) + int(extra_bytes) + (4 << 20)
    return int(min(max(need, 32 << 20), 48 << 20))


def channel_attention(x, w1, b1, w2, b2, *,
                      fuse_block_bytes=4 << 20,
                      pool_block_bytes=4 << 20,
                      mul_block_bytes=2 << 20):
    """ChannelAttention forward.

    x : (N, C, H, W)
    w1: (hid, C), b1: (hid,)   -- Linear(C, C//r)      (PyTorch layout)
    w2: (C, hid), b2: (C,)     -- Linear(C//r, C)
    """
    N, C, H, W = x.shape
    S = H * W
    hid = w1.shape[0]
    # TODO(synk): hid == 0 (reduction_ratio > input_channels) is degenerate in
    # the PyTorch module as well (Linear(C, 0)) and is not handled here.

    itemsize = _itemsize(x.dtype)
    slab_bytes = C * S * itemsize

    x3 = x.reshape(N, C, S)                               # lane axis = H*W (lane-dense)
    w1t = jnp.asarray(w1, jnp.float32).T                  # (C, hid)
    b1r = jnp.asarray(b1, jnp.float32).reshape(1, hid)    # (1, hid)
    w2m = jnp.asarray(w2, jnp.float32)                    # (C, hid)
    b2c = jnp.asarray(b2, jnp.float32).reshape(C, 1)      # (C, 1)
    w_bytes = 4 * (w1t.size + b1r.size + w2m.size + b2c.size)

    inv_s = 1.0 / float(S)

    def mlp_sigmoid(avg, mx, w1t_v, b1_v, w2_v, b2_v):
        # Shared MLP on a (C,) channel vector.  Problem size is C x C//16, so
        # keep it on the VPU/XLU (broadcast-multiply + reduce), not the MXU.
        def mlp(v):                                       # v: (C, 1)
            h = jnp.sum(w1t_v * v, axis=0, keepdims=True) + b1_v     # (1, hid)
            h = jnp.maximum(h, 0.0)
            return jnp.sum(w2_v * h, axis=1, keepdims=True) + b2_v   # (C, 1)
        return jax.nn.sigmoid(mlp(avg) + mlp(mx))         # (C, 1)

    # =================== fused single-pass path ===================
    if slab_bytes <= fuse_block_bytes:
        def fused_kernel(x_ref, w1t_ref, b1_ref, w2_ref, b2_ref, o_ref):
            xb = x_ref[0].astype(jnp.float32)             # (C, S)
            avg = jnp.sum(xb, axis=1, keepdims=True) * inv_s
            mx = jnp.max(xb, axis=1, keepdims=True)
            scale = mlp_sigmoid(avg, mx, w1t_ref[...], b1_ref[...],
                                w2_ref[...], b2_ref[...])             # (C, 1)
            o_ref[0] = (xb * scale).astype(o_ref.dtype)

        buf_bytes = 4 * slab_bytes                        # in + out, double-buffered
        extra = 2 * C * S * 4 + w_bytes                   # f32 temporaries + weights
        out3 = pl.pallas_call(
            fused_kernel,
            out_shape=jax.ShapeDtypeStruct((N, C, S), x.dtype),
            grid_spec=pltpu.PrefetchScalarGridSpec(
                num_scalar_prefetch=0,
                grid=(N,),
                in_specs=[
                    pl.BlockSpec((1, C, S), lambda n: (n, 0, 0)),   # x slab
                    pl.BlockSpec((C, hid), lambda n: (0, 0)),       # W1^T
                    pl.BlockSpec((1, hid), lambda n: (0, 0)),       # b1
                    pl.BlockSpec((C, hid), lambda n: (0, 0)),       # W2
                    pl.BlockSpec((C, 1), lambda n: (0, 0)),         # b2
                ],
                out_specs=pl.BlockSpec((1, C, S), lambda n: (n, 0, 0)),
            ),
            compiler_params=pltpu.CompilerParams(
                dimension_semantics=("parallel",),
                vmem_limit_bytes=_vmem_limit(buf_bytes, extra),
            ),
            cost_estimate=pl.CostEstimate(
                flops=int(3 * N * C * S + 8 * N * C * hid),
                transcendentals=int(N * C),
                bytes_accessed=int(2 * N * C * S * itemsize + w_bytes),
            ),
        )(x3, w1t, b1r, w2m, b2c)
        return out3.reshape(N, C, H, W)

    # =================== streaming two-pass path ===================
    # ---------- pass 1: global avg/max pool + shared MLP + sigmoid ----------
    ts_a = _spatial_tile(S, C, itemsize, pool_block_bytes)
    grid_a = (N, pl.cdiv(S, ts_a))
    needs_mask = (S % ts_a) != 0

    def pool_mlp_kernel(x_ref, w1t_ref, b1_ref, w2_ref, b2_ref,
                        scale_ref, sum_sc, max_sc):
        s_idx = pl.program_id(1)

        @pl.when(s_idx == 0)
        def _init():
            sum_sc[...] = jnp.zeros_like(sum_sc)
            max_sc[...] = jnp.full_like(max_sc, -jnp.inf)

        xb = x_ref[0].astype(jnp.float32)                 # (C, ts_a)
        if needs_mask:
            # Tail tile of a cdiv grid: OOB lanes hold unspecified data.
            lane = jax.lax.broadcasted_iota(jnp.int32, (1, ts_a), 1)
            valid = (s_idx * ts_a + lane) < S
            xb_s = jnp.where(valid, xb, 0.0)
            xb_m = jnp.where(valid, xb, -jnp.inf)
        else:
            xb_s = xb
            xb_m = xb
        sum_sc[...] = sum_sc[...] + jnp.sum(xb_s, axis=1, keepdims=True)
        max_sc[...] = jnp.maximum(max_sc[...],
                                  jnp.max(xb_m, axis=1, keepdims=True))

        @pl.when(s_idx == pl.num_programs(1) - 1)
        def _finalize():
            avg = sum_sc[...] * inv_s                     # (C, 1)
            scale_ref[0] = mlp_sigmoid(avg, max_sc[...], w1t_ref[...],
                                       b1_ref[...], w2_ref[...], b2_ref[...])

    pool_buf = 2 * C * ts_a * itemsize                    # double-buffered input
    scale = pl.pallas_call(
        pool_mlp_kernel,
        out_shape=jax.ShapeDtypeStruct((N, C, 1), jnp.float32),
        grid_spec=pltpu.PrefetchScalarGridSpec(
            num_scalar_prefetch=0,
            grid=grid_a,
            in_specs=[
                pl.BlockSpec((1, C, ts_a), lambda n, s: (n, 0, s)),   # x tiles
                pl.BlockSpec((C, hid), lambda n, s: (0, 0)),          # W1^T
                pl.BlockSpec((1, hid), lambda n, s: (0, 0)),          # b1
                pl.BlockSpec((C, hid), lambda n, s: (0, 0)),          # W2
                pl.BlockSpec((C, 1), lambda n, s: (0, 0)),            # b2
            ],
            out_specs=pl.BlockSpec((1, C, 1), lambda n, s: (n, 0, 0)),
            scratch_shapes=[
                pltpu.VMEM((C, 1), jnp.float32),   # running sum (f32)
                pltpu.VMEM((C, 1), jnp.float32),   # running max
            ],
        ),
        compiler_params=pltpu.CompilerParams(
            dimension_semantics=("parallel", "arbitrary"),
            vmem_limit_bytes=_vmem_limit(pool_buf, w_bytes + 8 * C * ts_a),
        ),
        cost_estimate=pl.CostEstimate(
            flops=int(2 * N * C * S + 8 * N * C * hid),
            transcendentals=int(N * C),
            bytes_accessed=int(N * C * S * itemsize + N * C * 4 + w_bytes),
        ),
    )(x3, w1t, b1r, w2m, b2c)

    # ---------- pass 2: lane-dense streaming multiply x * scale ----------
    ts_b = _spatial_tile(S, C, itemsize, mul_block_bytes)
    grid_b = (N, pl.cdiv(S, ts_b))

    def scale_mul_kernel(x_ref, scale_ref, o_ref):
        # (1, C, ts_b) * (1, C, 1) -> broadcast over the lane (spatial) axis.
        o_ref[...] = (x_ref[...] * scale_ref[...]).astype(o_ref.dtype)

    mul_buf = 4 * C * ts_b * itemsize + 2 * C * 4         # in + out dbl-buffered + scale
    out3 = pl.pallas_call(
        scale_mul_kernel,
        out_shape=jax.ShapeDtypeStruct((N, C, S), x.dtype),
        grid_spec=pltpu.PrefetchScalarGridSpec(
            num_scalar_prefetch=0,
            grid=grid_b,
            in_specs=[
                pl.BlockSpec((1, C, ts_b), lambda n, s: (n, 0, s)),
                pl.BlockSpec((1, C, 1), lambda n, s: (n, 0, 0)),
            ],
            out_specs=pl.BlockSpec((1, C, ts_b), lambda n, s: (n, 0, s)),
        ),
        compiler_params=pltpu.CompilerParams(
            dimension_semantics=("parallel", "parallel"),
            vmem_limit_bytes=_vmem_limit(mul_buf),
        ),
        cost_estimate=pl.CostEstimate(
            flops=int(N * C * S),
            transcendentals=0,
            bytes_accessed=int(2 * N * C * S * itemsize + N * C * 4),
        ),
    )(x3, scale)

    return out3.reshape(N, C, H, W)


def channel_attention_reference(x, w1, b1, w2, b2):
    avg = jnp.mean(x, axis=(2, 3))          # (N, C)
    mx = jnp.max(x, axis=(2, 3))            # (N, C)

    def mlp(v):
        h = jnp.maximum(v @ w1.T + b1, 0.0)
        return h @ w2.T + b2

    out = mlp(avg) + mlp(mx)                # (N, C)
    s = jax.nn.sigmoid(out)
    return x * s[:, :, None, None]


if __name__ == "__main__":
    key = jax.random.PRNGKey(0)
    kx, k1, k2, k3, k4, kx2 = jax.random.split(key, 6)

    # channels must be >= reduction_ratio (PyTorch default r=16) to be
    # non-degenerate, so use C=64 -> hidden=4; spatial kept small.
    N, C, H, W = 2, 64, 32, 32
    reduction_ratio = 16
    hid = C // reduction_ratio

    x = jax.random.normal(kx, (N, C, H, W), dtype=jnp.float32)
    w1 = jax.random.normal(k1, (hid, C), dtype=jnp.float32) * 0.1
    b1 = jax.random.normal(k2, (hid,), dtype=jnp.float32) * 0.1
    w2 = jax.random.normal(k3, (C, hid), dtype=jnp.float32) * 0.1
    b2 = jax.random.normal(k4, (C,), dtype=jnp.float32) * 0.1

    ref = channel_attention_reference(x, w1, b1, w2, b2)

    # 1) default: fused single-pass path (slab fits VMEM)
    out = jax.block_until_ready(channel_attention(x, w1, b1, w2, b2))
    assert out.shape == x.shape and out.dtype == x.dtype
    assert jnp.allclose(out, ref, atol=1e-5, rtol=1e-5), (
        float(jnp.max(jnp.abs(out - ref))))

    # 2) forced streaming two-pass path with small tiles: exercises the
    #    multi-step cross-tile sum/max accumulation.
    out_stream = jax.block_until_ready(
        channel_attention(x, w1, b1, w2, b2,
                          fuse_block_bytes=1,
                          pool_block_bytes=64 * 1024,
                          mul_block_bytes=32 * 1024))
    assert jnp.allclose(out_stream, ref, atol=1e-5, rtol=1e-5), (
        float(jnp.max(jnp.abs(out_stream - ref))))

    # 3) spatial extent not a multiple of 128 (H=W=20 -> S=400):
    #    fused path with a full (non-aligned) block, and the forced streaming
    #    path exercising the cdiv-grid tail mask / partial output block.
    H2, W2 = 20, 20
    x2 = jax.random.normal(kx2, (N, C, H2, W2), dtype=jnp.float32)
    ref2 = channel_attention_reference(x2, w1, b1, w2, b2)

    out2 = jax.block_until_ready(channel_attention(x2, w1, b1, w2, b2))
    assert jnp.allclose(out2, ref2, atol=1e-5, rtol=1e-5), (
        float(jnp.max(jnp.abs(out2 - ref2))))

    out2_stream = jax.block_until_ready(
        channel_attention(x2, w1, b1, w2, b2,
                          fuse_block_bytes=1,
                          pool_block_bytes=32 * 1024,
                          mul_block_bytes=32 * 1024))
    assert jnp.allclose(out2_stream, ref2, atol=1e-5, rtol=1e-5), (
        float(jnp.max(jnp.abs(out2_stream - ref2))))

    print("KERNEL_OK")
</pallas_src>

<mosaic_0001>
module attributes {stable_mosaic.version = 11 : i64} {
  func.func @fused_kernel(%arg0: i32, %arg1: memref<1x64x1024xf32, #tpu.memory_space<vmem>>, %arg2: memref<64x4xf32, #tpu.memory_space<vmem>>, %arg3: memref<1x4xf32, #tpu.memory_space<vmem>>, %arg4: memref<64x4xf32, #tpu.memory_space<vmem>>, %arg5: memref<64x1xf32, #tpu.memory_space<vmem>>, %arg6: memref<1x64x1024xf32, #tpu.memory_space<vmem>>) attributes {dimension_semantics = [#tpu.dimension_semantics<parallel>], iteration_bounds = array<i64: 2>, scalar_prefetch = 0 : i64, scratch_operands = 0 : i64, tpu.core_type = #tpu.core_type<tc>, window_params = [{transform_indices = @transform_0, window_bounds = array<i64: 1, 64, 1024>}, {pipeline_mode = #tpu.pipeline_mode<synchronous>, transform_indices = @transform_1, window_bounds = array<i64: 64, 4>}, {pipeline_mode = #tpu.pipeline_mode<synchronous>, transform_indices = @transform_2, window_bounds = array<i64: 1, 4>}, {pipeline_mode = #tpu.pipeline_mode<synchronous>, transform_indices = @transform_3, window_bounds = array<i64: 64, 4>}, {pipeline_mode = #tpu.pipeline_mode<synchronous>, transform_indices = @transform_4, window_bounds = array<i64: 64, 1>}, {transform_indices = @transform_5, window_bounds = array<i64: 1, 64, 1024>}]} {
    %c0 = arith.constant 0 : index
    %c0_0 = arith.constant 0 : index
    %c0_1 = arith.constant 0 : index
    %0 = vector.load %arg1[%c0, %c0_0, %c0_1] : memref<1x64x1024xf32, #tpu.memory_space<vmem>>, vector<1x64x1024xf32>
    %1 = vector.shape_cast %0 : vector<1x64x1024xf32> to vector<64x1024xf32>
    %cst = arith.constant dense<0.000000e+00> : vector<64xf32>
    %2 = vector.multi_reduction <add>, %1, %cst [1] : vector<64x1024xf32> to vector<64xf32>
    %3 = vector.shape_cast %2 : vector<64xf32> to vector<64x1xf32>
    %cst_2 = arith.constant 9.765625E-4 : f32
    %4 = vector.broadcast %cst_2 : f32 to vector<64x1xf32>
    %5 = arith.mulf %3, %4 : vector<64x1xf32>
    %cst_3 = arith.constant dense<0xFF800000> : vector<64xf32>
    %6 = vector.multi_reduction <maximumf>, %1, %cst_3 [1] : vector<64x1024xf32> to vector<64xf32>
    %7 = vector.shape_cast %6 : vector<64xf32> to vector<64x1xf32>
    %c0_4 = arith.constant 0 : index
    %c0_5 = arith.constant 0 : index
    %8 = vector.load %arg2[%c0_4, %c0_5] : memref<64x4xf32, #tpu.memory_space<vmem>>, vector<64x4xf32>
    %c0_6 = arith.constant 0 : index
    %c0_7 = arith.constant 0 : index
    %9 = vector.load %arg3[%c0_6, %c0_7] : memref<1x4xf32, #tpu.memory_space<vmem>>, vector<1x4xf32>
    %c0_8 = arith.constant 0 : index
    %c0_9 = arith.constant 0 : index
    %10 = vector.load %arg4[%c0_8, %c0_9] : memref<64x4xf32, #tpu.memory_space<vmem>>, vector<64x4xf32>
    %c0_10 = arith.constant 0 : index
    %c0_11 = arith.constant 0 : index
    %11 = vector.load %arg5[%c0_10, %c0_11] : memref<64x1xf32, #tpu.memory_space<vmem>>, vector<64x1xf32>
    %12 = vector.broadcast %5 : vector<64x1xf32> to vector<64x4xf32>
    %13 = arith.mulf %8, %12 : vector<64x4xf32>
    %cst_12 = arith.constant dense<0.000000e+00> : vector<4xf32>
    %14 = vector.multi_reduction <add>, %13, %cst_12 [0] : vector<64x4xf32> to vector<4xf32>
    %15 = vector.shape_cast %14 : vector<4xf32> to vector<1x4xf32>
    %16 = arith.addf %15, %9 : vector<1x4xf32>
    %cst_13 = arith.constant 0.000000e+00 : f32
    %17 = vector.broadcast %cst_13 : f32 to vector<1x4xf32>
    %18 = arith.maximumf %16, %17 : vector<1x4xf32>
    %19 = vector.broadcast %18 : vector<1x4xf32> to vector<64x4xf32>
    %20 = arith.mulf %10, %19 : vector<64x4xf32>
    %cst_14 = arith.constant dense<0.000000e+00> : vector<64xf32>
    %21 = vector.multi_reduction <add>, %20, %cst_14 [1] : vector<64x4xf32> to vector<64xf32>
    %22 = vector.shape_cast %21 : vector<64xf32> to vector<64x1xf32>
    %23 = arith.addf %22, %11 : vector<64x1xf32>
    %24 = vector.broadcast %7 : vector<64x1xf32> to vector<64x4xf32>
    %25 = arith.mulf %8, %24 : vector<64x4xf32>
    %cst_15 = arith.constant dense<0.000000e+00> : vector<4xf32>
    %26 = vector.multi_reduction <add>, %25, %cst_15 [0] : vector<64x4xf32> to vector<4xf32>
    %27 = vector.shape_cast %26 : vector<4xf32> to vector<1x4xf32>
    %28 = arith.addf %27, %9 : vector<1x4xf32>
    %cst_16 = arith.constant 0.000000e+00 : f32
    %29 = vector.broadcast %cst_16 : f32 to vector<1x4xf32>
    %30 = arith.maximumf %28, %29 : vector<1x4xf32>
    %31 = vector.broadcast %30 : vector<1x4xf32> to vector<64x4xf32>
    %32 = arith.mulf %10, %31 : vector<64x4xf32>
    %cst_17 = arith.constant dense<0.000000e+00> : vector<64xf32>
    %33 = vector.multi_reduction <add>, %32, %cst_17 [1] : vector<64x4xf32> to vector<64xf32>
    %34 = vector.shape_cast %33 : vector<64xf32> to vector<64x1xf32>
    %35 = arith.addf %34, %11 : vector<64x1xf32>
    %36 = arith.addf %23, %35 : vector<64x1xf32>
    %37 = arith.negf %36 : vector<64x1xf32>
    %38 = math.exp %37 : vector<64x1xf32>
    %cst_18 = arith.constant 1.000000e+00 : f32
    %39 = vector.broadcast %cst_18 : f32 to vector<64x1xf32>
    %40 = arith.addf %39, %38 : vector<64x1xf32>
    %41 = arith.divf %39, %40 : vector<64x1xf32>
    %42 = vector.broadcast %41 : vector<64x1xf32> to vector<64x1024xf32>
    %43 = arith.mulf %1, %42 : vector<64x1024xf32>
    %c0_19 = arith.constant 0 : index
    %c0_20 = arith.constant 0 : index
    %c0_21 = arith.constant 0 : index
    %44 = vector.load %arg6[%c0_19, %c0_20, %c0_21] : memref<1x64x1024xf32, #tpu.memory_space<vmem>>, vector<1x64x1024xf32>
    %45 = vector.shape_cast %44 : vector<1x64x1024xf32> to vector<64x1024xf32>
    %46 = vector.shape_cast %43 : vector<64x1024xf32> to vector<1x64x1024xf32>
    tpu.vector_store %arg6[%c0_19, %c0_20, %c0_21], %46 {strides = array<i32>} : memref<1x64x1024xf32, #tpu.memory_space<vmem>>, vector<1x64x1024xf32>,
    return
  }
  func.func @transform_0(%arg0: i32) -> (i32, i32, i32) {
    %c0_i32 = arith.constant 0 : i32
    %c0_i32_0 = arith.constant 0 : i32
    %c0_i32_1 = arith.constant 0 : i32
    return %arg0, %c0_i32, %c0_i32_0 : i32, i32, i32
  }
  func.func @transform_1(%arg0: i32) -> (i32, i32) {
    %c0_i32 = arith.constant 0 : i32
    %c0_i32_0 = arith.constant 0 : i32
    %c0_i32_1 = arith.constant 0 : i32
    return %c0_i32, %c0_i32_0 : i32, i32
  }
  func.func @transform_2(%arg0: i32) -> (i32, i32) {
    %c0_i32 = arith.constant 0 : i32
    %c0_i32_0 = arith.constant 0 : i32
    %c0_i32_1 = arith.constant 0 : i32
    return %c0_i32, %c0_i32_0 : i32, i32
  }
  func.func @transform_3(%arg0: i32) -> (i32, i32) {
    %c0_i32 = arith.constant 0 : i32
    %c0_i32_0 = arith.constant 0 : i32
    %c0_i32_1 = arith.constant 0 : i32
    return %c0_i32, %c0_i32_0 : i32, i32
  }
  func.func @transform_4(%arg0: i32) -> (i32, i32) {
    %c0_i32 = arith.constant 0 : i32
    %c0_i32_0 = arith.constant 0 : i32
    %c0_i32_1 = arith.constant 0 : i32
    return %c0_i32, %c0_i32_0 : i32, i32
  }
  func.func @transform_5(%arg0: i32) -> (i32, i32, i32) {
    %c0_i32 = arith.constant 0 : i32
    %c0_i32_0 = arith.constant 0 : i32
    %c0_i32_1 = arith.constant 0 : i32
    return %arg0, %c0_i32, %c0_i32_0 : i32, i32, i32
  }
}

</mosaic_0001>

<bundles_post_ra>
// kernel: tpu_custom_call.1
= control target key start
LH: loop header
LB: loop body
LE: loop exit
PB: predicated region body
PF: predicated region fallthrough
CT: control target
= control target key end

     0   :  { %10 = vsyncpa [#allocation3], 0  ;;  %s1913_s0 = inlined_call_operand.hbm [shape: f32[2,64,1024], index: 0, kind: input, shape index: {}]   ;;  %s1914_s1 = inlined_call_operand.vmem [shape: f32[64,4], index: 1, kind: input, shape index: {}]   ;;  %s1915_s2 = inlined_call_operand.vmem [shape: f32[1,4], index: 2, kind: input, shape index: {}]   ;;  %s1916_s3 = inlined_call_operand.vmem [shape: f32[64,4], index: 3, kind: input, shape index: {}]   ;;  %s1917_s4 = inlined_call_operand.vmem [shape: f32[64,1], index: 4, kind: input, shape index: {}]   ;;  %s1918_s5 = inlined_call_operand.hbm [shape: f32[2,64,1024], index: 5, kind: output, shape index: {}]  }
   0x1   :  { %12 = vsyncpa [#allocation3 + $0x1], 0 }
   0x2   :  { %13 = vsyncpa [#allocation4], 0 }
   0x3   :  { %15 = vsyncpa [#allocation4 + $0x1], 0  ;;  %s1345_s18 = smov 0   ;;  %s1347_s19 = smov 0  }
   0x4   :  { %s1349_s20 = smov 0   ;;  %s1351_s21 = smov 0  }
   0x5 LB: > { %s1366_s22 = sadd.s32 4294967295, %s1308_s21   ;;  %s1048_s23 = sadd.s32 4294967294, %s1308_s21   ;;  %s1308_s21 = sphi %s1351_s21, %s1932_s21   ;;  %s1304_s20 = sphi %s1349_s20, %s1931_s20   ;;  %s1300_s19 = sphi %s1347_s19, %s1930_s19   ;;  %s1296_s18 = sphi %s1345_s18, %s1929_s18  }
   0x6   : > { %s1370_s24 = sadd.s32 1, %s1308_s21   ;;  %s28_s25 = sadd.s32 1, %s1304_s20 }
   0x7   : > { %s25_s26 = ssub.s32 %s1308_s21, %s1370_s24  ;;  %p35_p0 = scmp.ne.s32.totalorder %s1304_s20, %s1300_s19 }
   0x8   : > { %p26_p1 = scmp.eq.s32.totalorder %s25_s26, 0  ;;  %p36_p2 = scmp.eq.s32.totalorder %s1308_s21, 0 }
   0x9   : > { %p41_p3 = scmp.ne.s32.totalorder %s1300_s19, %s1296_s18  ;;  %p42_p4 = scmp.eq.s32.totalorder %s1366_s22, 0 }
   0xa   : > { %s1382_s27 = scalar_select %p26_p1, %s1304_s20, %s28_s25  }
   0xb   : > { %p1384_p5 = por %p36_p2, %p35_p0  ;;  %p1388_p6 = por %p42_p4, %p41_p3 }
   0xc   : > { %p149_p7 = scmp.eq.s32.totalorder %s1366_s22, 1  ;;  %p155_p8 = scmp.eq.s32.totalorder %s1048_s23, 1 }
   0xd   : > { %p1084_p10 = scmp.lt.s32.totalorder %s1308_s21, 2  ;;  %s187_s7 = sand.u32 1, %s1304_s20  }
   0xe   : > { %p1395_p11 = por %p149_p7, %p35_p0  ;;  %p1399_p12 = por %p155_p8, %p41_p3 }
   0xf   : > { %s1070_s8 = sshll.u32 %s1308_s21, 9  ;;  %s1051_s9 = sshll.u32 %s187_s7, 9 }
  0x10   : > { %s196_s12 = scalar_lea.hbm %s1913_s0, %s1070_s8  ;;  %s191_s14 = scalar_lea.vmem [#allocation2], %s1051_s9 }
  0x11   : > { %s197_s13 = sshll.u32 %s196_s12, 4  ;;  %s199_s15 = sshll.u32 %s191_s14, 4  ;;  %s198_s13 = int_to_ptr.hbm [resolvable:$true] %s197_s13  ;;  %s200_s15 = int_to_ptr.vmem [resolvable:$true] %s199_s15 }
  0x12   : > { %p1410_p13 = pnand %p1084_p10, %p1384_p5  ;;  %p1054_p0 = scmp.ge.s32.totalorder %s1308_s21, 1 }
  0x13   : > { %p207_p1 = scmp.lt.s32.totalorder %s1308_s21, 3  ;;  %s188_s17 = scalar_lea.sflag [#allocation3], %s187_s7 }
  0x14   : > { %s1212_s23 = sshra.s32 %s198_s13, 4  ;;  %p1216_p3 = pneg %p1410_p13  ;;  %s1213_s23 = int_to_ptr.hbm [resolvable:$true] %s1212_s23 }
  0x15   : > { %s1214_s25 = scalar_lea.hbm %s1213_s23, 512  ;;  %s1219_s28 = scalar_lea.hbm %s1913_s0, 1024 }
  0x16   : > { %p1215_p2 = scmp.ne.s32.totalorder %s1213_s23, %s1214_s25  ;;  %p1220_p5 = scmp.lt.s32.totalorder %s1213_s23, %s1913_s0 }
  0x17   : > { %p1221_p8 = scmp.lt.s32.totalorder %s1219_s28, %s1214_s25 }
  0x18   : > { %p1217_p4 = pnand %p1216_p3, %p1215_p2 }
  0x19   : > { %p1222_p10 = por %p1221_p8, %p1220_p5 }
  0x1a   : > { %p1218_p7 = pneg %p1217_p4 }
  0x1c   : > { %p1223_p9 = pnand %p1222_p10, %p1218_p7 }
  0x1e   : > { %1226 = shalt.err (!%p1223_p9)
}
  0x1f   : > { %s1310_s7 = smov 1024   ;;  %s1311_s11 = smov 64  }
  0x20   : > { %1079 = dma.hbm_to_vmem [thread:$0]  (!%p1410_p13), %s198_s13, 8192, %s200_s15, %s188_s17, %s1310_s7, %s1310_s7, %s1311_s11  }
  0x21   : > { %p208_p2 = pnand %p1054_p0, %p207_p1 }
  0x22   : > { %s1431_s12 = sand.u32 (!%p208_p2), 1, %s1300_s19  }
  0x23   : > { %211 = sbr.rel (%p208_p2) target bundleno = 566 (0x236), region = 40  ;;  %s1055_s14 = sshll.u32 (!%p208_p2), %s1431_s12, 9 }
  0x24   : > { %s214_s23 = scalar_lea.sflag (!%p208_p2), [#allocation3], %s1431_s12  ;;  %s1437_s25 = scalar_lea.vmem (!%p208_p2), [#allocation2], %s1055_s14 }
  0x28   : > { %1287 = dma.done.wait (%p1388_p6), %s214_s23, 8192  }
  0x29   : > { %1289 = vsyncadd (%p1388_p6), %s214_s23, 4294959104  ;;  %v261_v0 = vld [vmem:[%s1437_s25 + $0x80] sm:$0xff]  ;;  %v262_v1 = vld [vmem:[%s1437_s25 + $0x88] sm:$0xff]  ;;  %vm494_vm0 = vcmask 31744   ;;  %s1754_s11 = scalar_lea.vmem [#allocation5], %s1055_s14  ;;  %s1071_s14 = sshll.u32 %s1366_s22, 9 }
  0x2a   : > { %v263_v2 = vld [vmem:[%s1437_s25 + $0x90] sm:$0xff]  ;;  %v327_v3 = vadd.f32 %v262_v1, %v261_v0  ;;  %v1447_v4 = vld [vmem:[%s1437_s25 + $0x98] sm:$0xff]  ;;  %v245_v5 = vld [vmem:[%s1437_s25] sm:$0xff]  ;;  %v407_v16 = vmax.f32 %v261_v0, %v262_v1  ;;  %s971_s22 = scalar_lea.hbm %s1918_s5, %s1071_s14  ;;  %s972_s13 = sshll.u32 %s1754_s11, 4  ;;  %s973_s13 = int_to_ptr.vmem [resolvable:$true] %s972_s13 }
  0x2b   : > { %v246_v7 = vld [vmem:[%s1437_s25 + $0x8] sm:$0xff]  ;;  %v247_v8 = vld [vmem:[%s1437_s25 + $0x10] sm:$0xff]  ;;  %v1453_v9 = vld [vmem:[%s1437_s25 + $0xa0] sm:$0xff]  ;;  %s974_s15 = sshll.u32 %s971_s22, 4  ;;  %s960_s16 = scalar_lea.sflag [#allocation4], %s1431_s12  ;;  %s975_s15 = int_to_ptr.hbm [resolvable:$true] %s974_s15 }
  0x2c   : > { %v328_v6 = vadd.f32 %v327_v3, %v263_v2  ;;  %v309_v10 = vadd.f32 %v246_v7, %v245_v5  ;;  %v389_v11 = vmax.f32 %v245_v5, %v246_v7  ;;  %v248_v13 = vld [vmem:[%s1437_s25 + $0x18] sm:$0xff]  ;;  %v253_v14 = vld [vmem:[%s1437_s25 + $0x40] sm:$0xff]  ;;  %v254_v15 = vld [vmem:[%s1437_s25 + $0x48] sm:$0xff]  ;;  %v408_v38 = vmax.f32 %v407_v16, %v263_v2  ;;  %s1256_s17 = sshra.s32 %s975_s15, 4  ;;  %s1257_s17 = int_to_ptr.hbm [resolvable:$true] %s1256_s17 }
  0x2d   : > { %v1460_v17 = vld [vmem:[%s1437_s25 + $0xa8] sm:$0xff]  ;;  %v255_v19 = vld [vmem:[%s1437_s25 + $0x50] sm:$0xff]  ;;  %v398_v20 = vmax.f32 %v253_v14, %v254_v15  ;;  %v318_v22 = vadd.f32 %v254_v15, %v253_v14  ;;  %v249_v25 = vld [vmem:[%s1437_s25 + $0x20] sm:$0xff]  ;;  %s1258_s26 = scalar_lea.hbm %s1257_s17, 512  ;;  %p1263_p0 = scmp.lt.s32.totalorder %s1257_s17, %s1918_s5 }
  0x2e   : > { %v329_v12 = vadd.f32 %v328_v6, %v1447_v4  ;;  %v310_v18 = vadd.f32 %v309_v10, %v247_v8  ;;  %v390_v21 = vmax.f32 %v389_v11, %v247_v8  ;;  %v1464_v23 = vld [vmem:[%s1437_s25 + $0xb0] sm:$0xff]  ;;  %v256_v26 = vld [vmem:[%s1437_s25 + $0x58] sm:$0xff]  ;;  %v269_v31 = vld [vmem:[%s1437_s25 + $0xc0] sm:$0xff]  ;;  %v409_v0 = vmax.f32 %v408_v38, %v1447_v4  ;;  %p1259_p6 = scmp.ne.s32.totalorder %s1257_s17, %s1258_s26 }
  0x2f   : > { %v399_v28 = vmax.f32 %v398_v20, %v255_v19  ;;  %v319_v30 = vadd.f32 %v318_v22, %v255_v19  ;;  %v270_v32 = vld [vmem:[%s1437_s25 + $0xc8] sm:$0xff]  ;;  %v271_v33 = vld [vmem:[%s1437_s25 + $0xd0] sm:$0xff]  ;;  %v257_v36 = vld [vmem:[%s1437_s25 + $0x60] sm:$0xff] }
  0x30   : > { %v330_v24 = vadd.f32 %v329_v12, %v1453_v9  ;;  %v311_v27 = vadd.f32 %v310_v18, %v248_v13  ;;  %v391_v29 = vmax.f32 %v390_v21, %v248_v13  ;;  %v250_v35 = vld [vmem:[%s1437_s25 + $0x28] sm:$0xff]  ;;  %v336_v37 = vadd.f32 %v270_v32, %v269_v31  ;;  %v1476_v40 = vld [vmem:[%s1437_s25 + $0xb8] sm:$0xff]  ;;  %v277_v46 = vld [vmem:[%s1437_s25 + $0x100] sm:$0xff]  ;;  %p1260_p9 = pnand %p1259_p6, %p1395_p11 }
  0x31   : > { %v416_v39 = vmax.f32 %v269_v31, %v270_v32  ;;  %v400_v42 = vmax.f32 %v399_v28, %v256_v26  ;;  %v320_v44 = vadd.f32 %v319_v30, %v256_v26  ;;  %v272_v45 = vld [vmem:[%s1437_s25 + $0xd8] sm:$0xff]  ;;  %v251_v48 = vld [vmem:[%s1437_s25 + $0x30] sm:$0xff]  ;;  %v258_v49 = vld [vmem:[%s1437_s25 + $0x68] sm:$0xff] }
  0x32   : > { %v331_v34 = vadd.f32 %v330_v24, %v1460_v17  ;;  %v312_v41 = vadd.f32 %v311_v27, %v249_v25  ;;  %v392_v43 = vmax.f32 %v391_v29, %v249_v25  ;;  %v337_v50 = vadd.f32 %v336_v37, %v271_v33  ;;  %v278_v51 = vld [vmem:[%s1437_s25 + $0x108] sm:$0xff]  ;;  %v273_v57 = vld [vmem:[%s1437_s25 + $0xe0] sm:$0xff]  ;;  %v279_v58 = vld [vmem:[%s1437_s25 + $0x110] sm:$0xff]  ;;  %p1261_p13 = pneg %p1260_p9 }
  0x33   : > { %v417_v52 = vmax.f32 %v416_v39, %v271_v33  ;;  %v401_v54 = vmax.f32 %v400_v42, %v257_v36  ;;  %v321_v56 = vadd.f32 %v320_v44, %v257_v36  ;;  %v1488_v60 = vld [vmem:[%s1437_s25 + $0x38] sm:$0xff]  ;;  %v259_v61 = vld [vmem:[%s1437_s25 + $0x70] sm:$0xff]  ;;  %v345_v63 = vadd.f32 %v278_v51, %v277_v46  ;;  %v1493_v6 = vld [vmem:[%s1437_s25 + $0xe8] sm:$0xff] }
  0x34   : > { %v332_v47 = vadd.f32 %v331_v34, %v1464_v23  ;;  %v313_v53 = vadd.f32 %v312_v41, %v250_v35  ;;  %v393_v55 = vmax.f32 %v392_v43, %v250_v35  ;;  %v338_v62 = vadd.f32 %v337_v50, %v272_v45  ;;  %v280_v7 = vld [vmem:[%s1437_s25 + $0x118] sm:$0xff]  ;;  %v285_v4 = vld [vmem:[%s1437_s25 + $0x140] sm:$0xff]  ;;  %v286_v14 = vld [vmem:[%s1437_s25 + $0x148] sm:$0xff] }
  0x35   : > { %v402_v2 = vmax.f32 %v401_v54, %v258_v49  ;;  %v322_v5 = vadd.f32 %v321_v56, %v258_v49  ;;  %v260_v8 = vld [vmem:[%s1437_s25 + $0x78] sm:$0xff]  ;;  %v346_v11 = vadd.f32 %v345_v63, %v279_v58  ;;  %v418_v12 = vmax.f32 %v417_v52, %v272_v45  ;;  %v281_v18 = vld [vmem:[%s1437_s25 + $0x120] sm:$0xff]  ;;  %v294_v20 = vld [vmem:[%s1437_s25 + $0x188] sm:$0xff] }
  0x36   : > { %v333_v59 = vadd.f32 %v332_v47, %v1476_v40  ;;  %v314_v1 = vadd.f32 %v313_v53, %v251_v48  ;;  %v394_v3 = vmax.f32 %v393_v55, %v251_v48  ;;  %v339_v10 = vadd.f32 %v338_v62, %v273_v57  ;;  %v293_v19 = vld [vmem:[%s1437_s25 + $0x180] sm:$0xff]  ;;  %v1504_v21 = vld [vmem:[%s1437_s25 + $0xf0] sm:$0xff]  ;;  %v1511_v31 = vld [vmem:[%s1437_s25 + $0x128] sm:$0xff] }
  0x37   : > { %v425_v13 = vmax.f32 %v277_v46, %v278_v51  ;;  %v403_v16 = vmax.f32 %v402_v2, %v259_v61  ;;  %v347_v24 = vadd.f32 %v346_v11, %v280_v7  ;;  %v410_v25 = vmax.f32 %v409_v0, %v1453_v9  ;;  %v287_v27 = vld [vmem:[%s1437_s25 + $0x150] sm:$0xff]  ;;  %v1514_v34 = vld [vmem:[%s1437_s25 + $0x1c0] sm:$0xff]  ;;  %v288_v38 = vld [vmem:[%s1437_s25 + $0x158] sm:$0xff] }
  0x38   : > { %334 = vadd.xlane.f32.xlu1 %v333_v59  ;;  %v315_v15 = vadd.f32 %v314_v1, %v1488_v60  ;;  %v340_v22 = vadd.f32 %v339_v10, %v1493_v6  ;;  %v295_v28 = vld [vmem:[%s1437_s25 + $0x190] sm:$0xff]  ;;  %v323_v30 = vadd.f32 %v322_v5, %v259_v61  ;;  %v354_v32 = vadd.f32 %v286_v14, %v285_v4  ;;  %v302_v39 = vld [vmem:[%s1437_s25 + $0x1c8] sm:$0xff]  ;;  %v1526_v47 = vld [vmem:[%s1437_s25 + $0xf8] sm:$0xff] }
  0x39   : > { %v426_v26 = vmax.f32 %v425_v13, %v279_v58  ;;  %v404_v29 = vmax.f32 %v403_v16, %v260_v8  ;;  %v363_v33 = vadd.f32 %v294_v20, %v293_v19  ;;  %v395_v35 = vmax.f32 %v394_v3, %v1488_v60  ;;  %v1521_v42 = vld [vmem:[%s1437_s25 + $0x130] sm:$0xff]  ;;  %v296_v49 = vld [vmem:[%s1437_s25 + $0x198] sm:$0xff]  ;;  %v289_v56 = vld [vmem:[%s1437_s25 + $0x160] sm:$0xff] }
  0x3a   : > { %316 = vadd.xlane.f32.xlu0 %v315_v15  ;;  %v348_v9 = vadd.f32 %v347_v24, %v281_v18  ;;  %v419_v36 = vmax.f32 %v418_v12, %v273_v57  ;;  %v341_v41 = vadd.f32 %v340_v22, %v1504_v21  ;;  %v355_v43 = vadd.f32 %v354_v32, %v287_v27  ;;  %v303_v45 = vld [vmem:[%s1437_s25 + $0x1d0] sm:$0xff]  ;;  %v1535_v59 = vld [vmem:[%s1437_s25 + $0x138] sm:$0xff]  ;;  %v297_v0 = vld [vmem:[%s1437_s25 + $0x1a0] sm:$0xff] }
  0x3b   : > { %v427_v37 = vmax.f32 %v426_v26, %v280_v7  ;;  %405 = vmax.xlane.f32.xlu2 %v404_v29  ;;  %v364_v44 = vadd.f32 %v363_v33, %v295_v28  ;;  %v372_v46 = vadd.f32 %v302_v39, %v1514_v34  ;;  %v324_v50 = vadd.f32 %v323_v30, %v260_v8  ;;  %v304_v63 = vld [vmem:[%s1437_s25 + $0x1d8] sm:$0xff]  ;;  %v290_v8 = vld [vmem:[%s1437_s25 + $0x168] sm:$0xff]  ;;  %v305_v12 = vld [vmem:[%s1437_s25 + $0x1e0] sm:$0xff] }
  0x3c   : > { %v349_v48 = vadd.f32 %v348_v9, %v1511_v31  ;;  %v411_v51 = vmax.f32 %v410_v25, %v1460_v17  ;;  %v356_v52 = vadd.f32 %v355_v43, %v288_v38  ;;  %v434_v53 = vmax.f32 %v285_v4, %v286_v14  ;;  %v1547_v4 = vld [vmem:[%s1437_s25 + $0x1a8] sm:$0xff]  ;;  %v1561_v32 = vld [vmem:[%s1437_s25 + $0x178] sm:$0xff] }
  0x3d   : > { %v428_v55 = vmax.f32 %v427_v37, %v281_v18  ;;  %v373_v57 = vadd.f32 %v372_v46, %v303_v45  ;;  %v342_v58 = vadd.f32 %v341_v41, %v1526_v47  ;;  %v420_v61 = vmax.f32 %v419_v36, %v1493_v6  ;;  %v306_v25 = vld [vmem:[%s1437_s25 + $0x1e8] sm:$0xff]  ;;  %v1566_v36 = vld [vmem:[%s1437_s25 + $0x1b8] sm:$0xff] }
  0x3e   : > { %v350_v54 = vadd.f32 %v349_v48, %v1521_v42  ;;  %v365_v62 = vadd.f32 %v364_v44, %v296_v49  ;;  %v443_v17 = vmax.f32 %v293_v19, %v294_v20  ;;  %v412_v1 = vmax.f32 %v411_v51, %v1464_v23  ;;  %v291_v19 = vld [vmem:[%s1437_s25 + $0x170] sm:$0xff]  ;;  %v308_v44 = vld [vmem:[%s1437_s25 + $0x1f8] sm:$0xff] }
  0x3f   : > { %v357_v2 = vadd.f32 %v356_v52, %v289_v56  ;;  %v435_v3 = vmax.f32 %v434_v53, %v287_v27  ;;  %v429_v7 = vmax.f32 %v428_v55, %v1511_v31  ;;  %v374_v10 = vadd.f32 %v373_v57, %v304_v63  ;;  %v1557_v27 = vld [vmem:[%s1437_s25 + $0x1b0] sm:$0xff] }
  0x40   : > { %396 = vmax.xlane.f32.xlu1 %v395_v35  ;;  %v351_v5 = vadd.f32 %v350_v54, %v1535_v59  ;;  %v421_v6 = vmax.f32 %v420_v61, %v1504_v21  ;;  %v366_v11 = vadd.f32 %v365_v62, %v297_v0  ;;  %v444_v13 = vmax.f32 %v443_v17, %v295_v28  ;;  %v307_v35 = vld [vmem:[%s1437_s25 + $0x1f0] sm:$0xff] }
  0x41   : > { %v413_v23 = vmax.f32 %v412_v1, %v1476_v40  ;;  %v358_v14 = vadd.f32 %v357_v2, %v290_v8  ;;  %v436_v15 = vmax.f32 %v435_v3, %v288_v38  ;;  %v452_v16 = vmax.f32 %v1514_v34, %v302_v39  ;;  %v461_v1 = vld [vmem:[%s1914_s1] sm:$0xff] }
  0x42   : > { %325 = vadd.xlane.f32.xlu0 %v324_v50  ;;  %v430_v18 = vmax.f32 %v429_v7, %v1521_v42  ;;  %v375_v20 = vadd.f32 %v374_v10, %v305_v12  ;;  %v422_v22 = vmax.f32 %v421_v6, %v1526_v47  ;;  %v367_v24 = vadd.f32 %v366_v11, %v1547_v4  ;;  %v463_v7 = vld [vmem:[%s1914_s1 + $0x10] sm:$0xff] }
  0x43   : > { %343 = vadd.xlane.f32.xlu2 %v342_v58  ;;  %v445_v26 = vmax.f32 %v444_v13, %v296_v49  ;;  %v359_v40 = vadd.f32 %v358_v14, %v291_v19  ;;  %v437_v28 = vmax.f32 %v436_v15, %v289_v56  ;;  %v453_v29 = vmax.f32 %v452_v16, %v303_v45 }
  0x44   : > { %v431_v30 = vmax.f32 %v430_v18, %v1535_v59  ;;  %v376_v33 = vadd.f32 %v375_v20, %v306_v25  ;;  %v368_v34 = vadd.f32 %v367_v24, %v1557_v27 }
  0x45   : > { %v446_v9 = vmax.f32 %v445_v26, %v297_v0  ;;  %v360_v37 = vadd.f32 %v359_v40, %v1561_v32  ;;  %v438_v38 = vmax.f32 %v437_v28, %v290_v8  ;;  %v454_v39 = vmax.f32 %v453_v29, %v304_v63  ;;  %v462_v0 = vld [vmem:[%s1914_s1 + $0x8] sm:$0xff] }
  0x46   : > { %v377_v41 = vadd.f32 %v376_v33, %v307_v35  ;;  %v369_v43 = vadd.f32 %v368_v34, %v1566_v36  ;;  %v466_v34 = vld [vmem:[%s1914_s1 + $0x28] sm:$0xff] }
  0x47   : > { %v447_v45 = vmax.f32 %v446_v9, %v1547_v4  ;;  %v439_v46 = vmax.f32 %v438_v38, %v291_v19  ;;  %v455_v48 = vmax.f32 %v454_v39, %v305_v12  ;;  %v465_v19 = vld [vmem:[%s1914_s1 + $0x20] sm:$0xff] }
  0x48   : > { %352 = vadd.xlane.f32.xlu1 %v351_v5  ;;  %v378_v49 = vadd.f32 %v377_v41, %v308_v44 }
  0x49   : > { %v448_v50 = vmax.f32 %v447_v45, %v1557_v27  ;;  %v440_v51 = vmax.f32 %v439_v46, %v1561_v32  ;;  %v456_v52 = vmax.f32 %v455_v48, %v306_v25 }
  0x4a   : > { %414 = vmax.xlane.f32.xlu0 %v413_v23  ;;  %v464_v23 = vld [vmem:[%s1914_s1 + $0x18] sm:$0xff] }
  0x4b   : > { %423 = vmax.xlane.f32.xlu2 %v422_v22  ;;  %v449_v53 = vmax.f32 %v448_v50, %v1566_v36  ;;  %v457_v54 = vmax.f32 %v456_v52, %v307_v35 }
  0x4d   : > { %v458_v55 = vmax.f32 %v457_v54, %v308_v44 }
  0x50   : > { %432 = vmax.xlane.f32.xlu1 %v431_v30 }
  0x52   : > { %361 = vadd.xlane.f32.xlu0 %v360_v37 }
  0x53   : > { %370 = vadd.xlane.f32.xlu2 %v369_v43  ;;  %v467_v43 = vld [vmem:[%s1914_s1 + $0x30] sm:$0xff] }
  0x58   : > { %379 = vadd.xlane.f32.xlu1 %v378_v49 }
  0x5a   : > { %441 = vmax.xlane.f32.xlu0 %v440_v51 }
  0x5b   : > { %450 = vmax.xlane.f32.xlu2 %v449_v53 }
  0x62   : > { %459 = vmax.xlane.f32.xlu0 %v458_v55  ;;  %v468_v55 = vld [vmem:[%s1914_s1 + $0x38] sm:$0xff] }
  0xab   : > { %v335_v56 = vpop.xlane.xlu1 %334 }
  0xac   : > { %v383_v3 = vmul.f32 0.0009765625, %v335_v56 }
  0xad   : > { %v317_v57 = vpop.xlane.xlu0 %316 }
  0xae   : > { %v406_v58 = vpop.xlane.xlu2 %405  ;;  %v381_v63 = vmul.f32 0.0009765625, %v317_v57  ;;  %v488_v12 = vmul.f32 %v463_v7, %v383_v3 }
  0xaf   : > { %v560_v40 = vmul.f32 %v462_v0, %v406_v58 }
  0xb0   : > { %v486_v8 = vmul.f32 %v461_v1, %v381_v63  ;;  %v498_v20 = vsel %vm494_vm0, %v488_v12, 0.0 }
  0xb1   : > { %v568_v38 = vsel %vm494_vm0, %v560_v40, 0.0 }
  0xb2   : > { %v495_v14 = vsel %vm494_vm0, %v486_v8, 0.0 }
  0xb3   : > { %v397_v61 = vpop.xlane.xlu1 %396 }
  0xb4   : > { %v559_v24 = vmul.f32 %v461_v1, %v397_v61 }
  0xb5   : > { %v326_v62 = vpop.xlane.xlu0 %325 }
  0xb6   : > { %v382_v17 = vmul.f32 0.0009765625, %v326_v62  ;;  %v344_v2 = vpop.xlane.xlu2 %343  ;;  %v567_v35 = vsel %vm494_vm0, %v559_v24, 0.0 }
  0xb7   : > { %v384_v11 = vmul.f32 0.0009765625, %v344_v2  ;;  %v569_v49 = vadd.f32 %v568_v38, %v567_v35 }
  0xb8   : > { %v487_v5 = vmul.f32 %v462_v0, %v382_v17 }
  0xb9   : > { %v489_v22 = vmul.f32 %v464_v23, %v384_v11 }
  0xba   : > { %v496_v6 = vsel %vm494_vm0, %v487_v5, 0.0 }
  0xbb   : > { %v353_v10 = vpop.xlane.xlu1 %352  ;;  %v497_v16 = vadd.f32 %v496_v6, %v495_v14  ;;  %v500_v30 = vsel %vm494_vm0, %v489_v22, 0.0 }
  0xbc   : > { %v385_v15 = vmul.f32 0.0009765625, %v353_v10 }
  0xbd   : > { %v415_v13 = vpop.xlane.xlu0 %414  ;;  %v499_v28 = vadd.f32 %v498_v20, %v497_v16 }
  0xbe   : > { %v424_v18 = vpop.xlane.xlu2 %423  ;;  %v490_v25 = vmul.f32 %v465_v19, %v385_v15  ;;  %v561_v29 = vmul.f32 %v463_v7, %v415_v13 }
  0xbf   : > { %v501_v39 = vadd.f32 %v500_v30, %v499_v28  ;;  %v562_v45 = vmul.f32 %v464_v23, %v424_v18 }
  0xc0   : > { %v502_v9 = vsel %vm494_vm0, %v490_v25, 0.0  ;;  %v570_v44 = vsel %vm494_vm0, %v561_v29, 0.0 }
  0xc1   : > { %v503_v50 = vadd.f32 %v502_v9, %v501_v39  ;;  %v571_v56 = vadd.f32 %v570_v44, %v569_v49  ;;  %v572_v61 = vsel %vm494_vm0, %v562_v45, 0.0  ;;  %v471_v44 = vld [vmem:[%s1916_s3 + $0x8] sm:$0xff]  ;;  %v470_v45 = vld [vmem:[%s1916_s3] sm:$0xff] }
  0xc3   : > { %v433_v26 = vpop.xlane.xlu1 %432  ;;  %v573_v3 = vadd.f32 %v572_v61, %v571_v56 }
  0xc4   : > { %v563_v51 = vmul.f32 %v465_v19, %v433_v26 }
  0xc5   : > { %v362_v33 = vpop.xlane.xlu0 %361 }
  0xc6   : > { %v386_v37 = vmul.f32 0.0009765625, %v362_v33  ;;  %v371_v41 = vpop.xlane.xlu2 %370  ;;  %v574_v0 = vsel %vm494_vm0, %v563_v51, 0.0 }
  0xc7   : > { %v387_v46 = vmul.f32 0.0009765625, %v371_v41  ;;  %v575_v11 = vadd.f32 %v574_v0, %v573_v3 }
  0xc8   : > { %v491_v48 = vmul.f32 %v466_v34, %v386_v37 }
  0xc9   : > { %v492_v54 = vmul.f32 %v467_v43, %v387_v46 }
  0xca   : > { %v504_v53 = vsel %vm494_vm0, %v491_v48, 0.0 }
  0xcb   : > { %v380_v52 = vpop.xlane.xlu1 %379  ;;  %v505_v58 = vadd.f32 %v504_v53, %v503_v50  ;;  %v506_v62 = vsel %vm494_vm0, %v492_v54, 0.0  ;;  %v474_v54 = vld [vmem:[%s1916_s3 + $0x20] sm:$0xff] }
  0xcc   : > { %v388_v57 = vmul.f32 0.0009765625, %v380_v52 }
  0xcd   : > { %v442_v63 = vpop.xlane.xlu0 %441  ;;  %v507_v2 = vadd.f32 %v506_v62, %v505_v58 }
  0xce   : > { %v493_v17 = vmul.f32 %v468_v55, %v388_v57  ;;  %v564_v1 = vmul.f32 %v466_v34, %v442_v63  ;;  %v451_v5 = vpop.xlane.xlu2 %450  ;;  %v469_v34 = vld [vmem:[%s1915_s2] sm:$0x1]  ;;  %v473_v57 = vld [vmem:[%s1916_s3 + $0x18] sm:$0xff] }
  0xcf   : > { %v565_v10 = vmul.f32 %v467_v43, %v451_v5  ;;  %v472_v43 = vld [vmem:[%s1916_s3 + $0x10] sm:$0xff] }
  0xd0   : > { %v508_v7 = vsel %vm494_vm0, %v493_v17, 0.0  ;;  %v576_v8 = vsel %vm494_vm0, %v564_v1, 0.0 }
  0xd1   : > { %v509_v6 = vadd.f32 %v508_v7, %v507_v2  ;;  %v577_v13 = vadd.f32 %v576_v8, %v575_v11  ;;  %v578_v23 = vsel %vm494_vm0, %v565_v10, 0.0  ;;  %v477_v7 = vld [vmem:[%s1916_s3 + $0x38] sm:$0xff]  ;;  %v475_v8 = vld [vmem:[%s1916_s3 + $0x28] sm:$0xff] }
  0xd3   : > { %v510_v12 = vrot.slane %v509_v6, 4  ;;  %v579_v18 = vadd.f32 %v578_v23, %v577_v13 }
  0xd5   : > { %v511_v14 = vadd.f32 %v510_v12, %v509_v6  ;;  %v460_v15 = vpop.xlane.xlu0 %459 }
  0xd6   : > { %v566_v16 = vmul.f32 %v468_v55, %v460_v15 }
  0xd7   : > { %v512_v19 = vrot.slane %v511_v14, 2 }
  0xd8   : > { %v580_v20 = vsel %vm494_vm0, %v566_v16, 0.0 }
  0xd9   : > { %v581_v22 = vadd.f32 %v580_v20, %v579_v18  ;;  %v513_v24 = vadd.f32 %v512_v19, %v511_v14  ;;  %v476_v14 = vld [vmem:[%s1916_s3 + $0x30] sm:$0xff] }
  0xdb   : > { %v582_v25 = vrot.slane %v581_v22, 4  ;;  %v514_v40 = vrot.slane %v513_v24, 1 }
  0xdd   : > { %v583_v26 = vadd.f32 %v582_v25, %v581_v22  ;;  %v515_v30 = vadd.f32 %v514_v40, %v513_v24 }
  0xdf   : > { %v584_v28 = vrot.slane %v583_v26, 2  ;;  %v516_v9 = vadd.f32 %v515_v30, %v469_v34 }
  0xe1   : > { %v585_v29 = vadd.f32 %v584_v28, %v583_v26  ;;  %v517_v39 = vmax.f32 %v516_v9, 0.0 }
  0xe3   : > { %v586_v33 = vrot.slane %v585_v29, 1  ;;  %v518_v50 = vperm.slane %v517_v39, 0 }
  0xe5   : > { %v587_v35 = vadd.f32 %v586_v33, %v585_v29  ;;  %v520_v55 = vmul.f32 %v518_v50, %v471_v44  ;;  %v523_v17 = vmul.f32 %v518_v50, %v474_v54  ;;  %v519_v0 = vmul.f32 %v518_v50, %v470_v45  ;;  %v479_v29 = vld [vmem:[%s1917_s4 + $0x8] sm:$0xff] }
  0xe6   : > { %v521_v1 = vmul.f32 %v518_v50, %v472_v43  ;;  %v526_v10 = vmul.f32 %v518_v50, %v477_v7  ;;  %v522_v6 = vmul.f32 %v518_v50, %v473_v57  ;;  %v524_v11 = vmul.f32 %v518_v50, %v475_v8 }
  0xe7   : > { %v588_v37 = vadd.f32 %v587_v35, %v469_v34  ;;  %v530_v61 = vsel %vm494_vm0, %v520_v55, 0.0  ;;  %v539_v2 = vsel %vm494_vm0, %v523_v17, 0.0  ;;  %v527_v3 = vsel %vm494_vm0, %v519_v0, 0.0  ;;  %v481_v17 = vld [vmem:[%s1917_s4 + $0x18] sm:$0xff] }
  0xe8   : > { %v533_v5 = vsel %vm494_vm0, %v521_v1, 0.0  ;;  %v548_v12 = vsel %vm494_vm0, %v526_v10, 0.0  ;;  %v536_v13 = vsel %vm494_vm0, %v522_v6, 0.0  ;;  %v542_v23 = vsel %vm494_vm0, %v524_v11, 0.0  ;;  %v483_v11 = vld [vmem:[%s1917_s4 + $0x28] sm:$0xff] }
  0xe9   : > { %v589_v38 = vmax.f32 %v588_v37, 0.0  ;;  %v525_v16 = vmul.f32 %v518_v50, %v476_v14 }
  0xeb   : > { %v590_v41 = vperm.slane %v589_v38, 0  ;;  %v545_v20 = vsel %vm494_vm0, %v525_v16, 0.0  ;;  %v1312_v38 = vmov 0  }
  0xec   : > { %1124 = vset.pattern.permute.xlu0 %v1312_v38  ;;  %1125 = vset.pattern.permute.xlu1 %v1312_v38 }
  0xed   : > { %v593_v46 = vmul.f32 %v590_v41, %v472_v43  ;;  %v592_v48 = vmul.f32 %v590_v41, %v471_v44  ;;  %v591_v49 = vmul.f32 %v590_v41, %v470_v45  ;;  %v595_v56 = vmul.f32 %v590_v41, %v474_v54  ;;  %1123 = vset.pattern.permute.xlu2 %v1312_v38  ;;  %v482_v43 = vld [vmem:[%s1917_s4 + $0x20] sm:$0xff]  ;;  %v480_v44 = vld [vmem:[%s1917_s4 + $0x10] sm:$0xff] }
  0xee   : > { %v594_v58 = vmul.f32 %v590_v41, %v473_v57  ;;  %v596_v15 = vmul.f32 %v590_v41, %v475_v8  ;;  %v597_v18 = vmul.f32 %v590_v41, %v476_v14  ;;  %v598_v24 = vmul.f32 %v590_v41, %v477_v7  ;;  %v478_v41 = vld [vmem:[%s1917_s4] sm:$0xff] }
  0xef   : > { %v605_v51 = vsel %vm494_vm0, %v593_v46, 0.0  ;;  %v602_v52 = vsel %vm494_vm0, %v592_v48, 0.0  ;;  %v599_v53 = vsel %vm494_vm0, %v591_v49, 0.0  ;;  %v611_v62 = vsel %vm494_vm0, %v595_v56, 0.0 }
  0xf0   : > { %606 = vadd.xlane.f32.xlu2 %v605_v51  ;;  %603 = vadd.xlane.f32.xlu1 %v602_v52  ;;  %v608_v63 = vsel %vm494_vm0, %v594_v58, 0.0  ;;  %v614_v19 = vsel %vm494_vm0, %v596_v15, 0.0  ;;  %v617_v22 = vsel %vm494_vm0, %v597_v18, 0.0  ;;  %v620_v25 = vsel %vm494_vm0, %v598_v24, 0.0 }
  0xf1   : > { %600 = vadd.xlane.f32.xlu0 %v599_v53 }
  0xf8   : > { %531 = vadd.xlane.f32.xlu2 %v530_v61  ;;  %612 = vadd.xlane.f32.xlu1 %v611_v62 }
  0xf9   : > { %609 = vadd.xlane.f32.xlu0 %v608_v63 }
 0x100   : > { %540 = vadd.xlane.f32.xlu2 %v539_v2  ;;  %528 = vadd.xlane.f32.xlu1 %v527_v3 }
 0x101   : > { %534 = vadd.xlane.f32.xlu0 %v533_v5 }
 0x108   : > { %549 = vadd.xlane.f32.xlu2 %v548_v12  ;;  %537 = vadd.xlane.f32.xlu1 %v536_v13  ;;  %v484_v13 = vld [vmem:[%s1917_s4 + $0x30] sm:$0xff] }
 0x109   : > { %543 = vadd.xlane.f32.xlu0 %v542_v23 }
 0x110   : > { %615 = vadd.xlane.f32.xlu2 %v614_v19  ;;  %546 = vadd.xlane.f32.xlu1 %v545_v20 }
 0x111   : > { %618 = vadd.xlane.f32.xlu0 %v617_v22 }
 0x118   : > { %621 = vadd.xlane.f32.xlu1 %v620_v25 }
 0x163   : > { %v607_v26 = vpop.xlane.xlu2 %606  ;;  %v604_v40 = vpop.xlane.xlu1 %603 }
 0x164   : > { %v601_v28 = vpop.xlane.xlu0 %600  ;;  %v624_v34 = vadd.f32 %v604_v40, %v479_v29  ;;  %v625_v53 = vadd.f32 %v607_v26, %v480_v44 }
 0x165   : > { %v623_v48 = vadd.f32 %v601_v28, %v478_v41 }
 0x16b   : > { %v532_v30 = vpop.xlane.xlu2 %531  ;;  %v613_v33 = vpop.xlane.xlu1 %612 }
 0x16c   : > { %v552_v35 = vadd.f32 %v532_v30, %v479_v29  ;;  %v610_v9 = vpop.xlane.xlu0 %609  ;;  %v627_v49 = vadd.f32 %v613_v33, %v482_v43 }
 0x16d   : > { %v626_v3 = vadd.f32 %v610_v9, %v481_v17 }
 0x16e   : > { %v632_v37 = vadd.f32 %v624_v34, %v552_v35 }
 0x170   : > { %v1058_v39 = vmul.f32 -1.442695, %v632_v37 }
 0x172   : > { %1126 = vpow2.f32 %v1058_v39 }
 0x173   : > { %v541_v45 = vpop.xlane.xlu2 %540  ;;  %v529_v46 = vpop.xlane.xlu1 %528 }
 0x174   : > { %v555_v50 = vadd.f32 %v541_v45, %v482_v43  ;;  %v551_v51 = vadd.f32 %v529_v46, %v478_v41  ;;  %v535_v52 = vpop.xlane.xlu0 %534  ;;  %v485_v41 = vld [vmem:[%s1917_s4 + $0x38] sm:$0xff] }
 0x175   : > { %v553_v54 = vadd.f32 %v535_v52, %v480_v44 }
 0x176   : > { %v635_v55 = vadd.f32 %v627_v49, %v555_v50  ;;  %v631_v56 = vadd.f32 %v623_v48, %v551_v51 }
 0x177   : > { %v633_v57 = vadd.f32 %v625_v53, %v553_v54 }
 0x178   : > { %v1127_v58 = vpop.eup %1126  ;;  %v1061_v61 = vmul.f32 -1.442695, %v635_v55  ;;  %v1057_v62 = vmul.f32 -1.442695, %v631_v56 }
 0x179   : > { %v664_v63 = vadd.f32 1.0, %v1127_v58  ;;  %v1059_v0 = vmul.f32 -1.442695, %v633_v57 }
 0x17a   : > { %1128 = vpow2.f32 %v1061_v61 }
 0x17b   : > { %1130 = vrcp.f32 %v664_v63  ;;  %v550_v1 = vpop.xlane.xlu2 %549  ;;  %v538_v2 = vpop.xlane.xlu1 %537  ;;  %v695_v30 = vand.u32 2147483647, %v664_v63  ;;  %v697_v33 = vand.u32 2147483648, %v664_v63  ;;  %vm691_vm2 = vweird.f32 %v664_v63 }
 0x17c   : > { %1132 = vpow2.f32 %v1057_v62  ;;  %v554_v5 = vadd.f32 %v538_v2, %v481_v17  ;;  %v544_v7 = vpop.xlane.xlu0 %543  ;;  %v558_v53 = vadd.f32 %v550_v1, %v485_v41 }
 0x17d   : > { %1134 = vpow2.f32 %v1059_v0  ;;  %v556_v19 = vadd.f32 %v544_v7, %v483_v11  ;;  %v698_v45 = vor.u32 1.1754944e-38, %v697_v33  ;;  %vm696_vm4 = vcmp.eq.f32.partialorder %v695_v30, 8.507059e+37 }
 0x17e   : > { %v634_v8 = vadd.f32 %v626_v3, %v554_v5 }
 0x180   : > { %v1129_v10 = vpop.eup %1128  ;;  %v1060_v6 = vmul.f32 -1.442695, %v634_v8 }
 0x181   : > { %v1131_v12 = vpop.eup %1130  ;;  %v1679_v16 = vadd.f32 1.0, %v1129_v10 }
 0x182   : > { %v1133_v23 = vpop.eup %1132  ;;  %1136 = vpow2.f32 %v1060_v6  ;;  %v687_v14 = vmul.f32 %v1131_v12, %v664_v63  ;;  %vm692_vm1 = vweird.f32 %v1131_v12 }
 0x183   : > { %v1135_v15 = vpop.eup %1134  ;;  %v1681_v18 = vadd.f32 1.0, %v1133_v23  ;;  %v616_v20 = vpop.xlane.xlu2 %615  ;;  %vm693_vm3 = vmor %vm691_vm2, %vm692_vm1 }
 0x184   : > { %v547_v22 = vpop.xlane.xlu1 %546  ;;  %v1683_v24 = vadd.f32 1.0, %v1135_v15  ;;  %v628_v25 = vadd.f32 %v616_v20, %v483_v11  ;;  %v619_v40 = vpop.xlane.xlu0 %618  ;;  %v688_v28 = vsub.f32 1.0, %v687_v14 }
 0x185   : > { %v557_v26 = vadd.f32 %v547_v22, %v484_v13  ;;  %1138 = vrcp.f32 %v1681_v18  ;;  %v629_v29 = vadd.f32 %v619_v40, %v484_v13  ;;  %v680_v51 = vand.u32 2147483647, %v1681_v18 }
 0x186   : > { %1140 = vrcp.f32 %v1683_v24  ;;  %v636_v34 = vadd.f32 %v628_v25, %v556_v19  ;;  %v689_v35 = vmul.f32 %v1131_v12, %v688_v28  ;;  %vm676_vm5 = vweird.f32 %v1681_v18 }
 0x187   : > { %v637_v9 = vadd.f32 %v629_v29, %v557_v26  ;;  %1142 = vrcp.f32 %v1679_v16  ;;  %v682_v62 = vand.u32 2147483648, %v1681_v18  ;;  %vm1701_vm6 = vcmp.eq.f32.partialorder %v680_v51, 8.507059e+37 }
 0x188   : > { %v1137_v37 = vpop.eup %1136  ;;  %v1062_v38 = vmul.f32 -1.442695, %v636_v34  ;;  %v690_v39 = vadd.f32 %v1131_v12, %v689_v35  ;;  %vm706_vm7 = vweird.f32 %v1683_v24  ;;  %v710_v0 = vand.u32 2147483647, %v1683_v24 }
 0x189   : > { %v1691_v43 = vadd.f32 1.0, %v1137_v37  ;;  %v1063_v44 = vmul.f32 -1.442695, %v637_v9  ;;  %v712_v5 = vand.u32 2147483648, %v1683_v24  ;;  %v683_v13 = vor.u32 1.1754944e-38, %v682_v62 }
 0x18a   : > { %1144 = vpow2.f32 %v1062_v38  ;;  %v694_v46 = vsel %vm693_vm3, %v1131_v12, %v690_v39  ;;  %vm711_vm11 = vcmp.eq.f32.partialorder %v710_v0, 8.507059e+37  ;;  %vm736_vm3 = vweird.f32 %v1679_v16 }
 0x18b   : > { %v1139_v48 = vpop.eup %1138  ;;  %1146 = vrcp.f32 %v1691_v43  ;;  %v699_v50 = vsel %vm696_vm4, %v698_v45, %v694_v46  ;;  %v713_v20 = vor.u32 1.1754944e-38, %v712_v5  ;;  %v727_v25 = vand.u32 2147483648, %v1691_v43 }
 0x18c   : > { %v622_v49 = vpop.xlane.xlu1 %621  ;;  %v1141_v52 = vpop.eup %1140  ;;  %1148 = vpow2.f32 %v1063_v44  ;;  %798 = vperm.xlu0 %1124, %v699_v50   ;;  %v672_v55 = vmul.f32 %v1139_v48, %v1681_v18  ;;  %vm677_vm8 = vweird.f32 %v1139_v48  ;;  %v725_v30 = vand.u32 2147483647, %v1691_v43 }
 0x18d   : > { %v630_v54 = vadd.f32 %v622_v49, %v485_v41  ;;  %v702_v56 = vmul.f32 %v1141_v52, %v1683_v24  ;;  %v1697_v57 = vpop.eup %1142  ;;  %vm707_vm9 = vweird.f32 %v1141_v52  ;;  %vm678_vm10 = vmor %vm676_vm5, %vm677_vm8  ;;  %vm721_vm14 = vweird.f32 %v1691_v43 }
 0x18e   : > { %v673_v61 = vsub.f32 1.0, %v672_v55  ;;  %v732_v6 = vmul.f32 %v1697_v57, %v1679_v16  ;;  %vm708_vm12 = vmor %vm706_vm7, %vm707_vm9  ;;  %v728_v9 = vor.u32 1.1754944e-38, %v727_v25  ;;  %vm726_vm0 = vcmp.eq.f32.partialorder %v725_v30, 8.507059e+37  ;;  %v1159_v25 = vld [vmem:[%s1437_s25 + $0x8] sm:$0xff]  ;;  %v1162_v30 = vld [vmem:[%s1437_s25 + $0x20] sm:$0xff] }
 0x18f   : > { %v638_v58 = vadd.f32 %v630_v54, %v558_v53  ;;  %v703_v17 = vsub.f32 1.0, %v702_v56  ;;  %vm737_vm1 = vweird.f32 %v1697_v57  ;;  %v740_v54 = vand.u32 2147483647, %v1679_v16 }
 0x190   : > { %v1145_v1 = vpop.eup %1144  ;;  %v674_v3 = vmul.f32 %v1139_v48, %v673_v61  ;;  %v733_v28 = vsub.f32 1.0, %v732_v6  ;;  %vm1735_vm4 = vmor %vm736_vm3, %vm737_vm1 }
 0x191   : > { %v1064_v2 = vmul.f32 -1.442695, %v638_v58  ;;  %v1147_v7 = vpop.eup %1146  ;;  %v1708_v8 = vadd.f32 1.0, %v1145_v1  ;;  %v704_v10 = vmul.f32 %v1141_v52, %v703_v17  ;;  %vm741_vm8 = vcmp.eq.f32.partialorder %v740_v54, 8.507059e+37 }
 0x192   : > { %v1149_v11 = vpop.eup %1148  ;;  %v675_v12 = vadd.f32 %v1139_v48, %v674_v3  ;;  %v717_v23 = vmul.f32 %v1147_v7, %v1691_v43  ;;  %vm722_vm13 = vweird.f32 %v1147_v7  ;;  %v734_v37 = vmul.f32 %v1697_v57, %v733_v28 }
 0x193   : > { %1150 = vpow2.f32 %v1064_v2  ;;  %v1714_v14 = vadd.f32 1.0, %v1149_v11  ;;  %v705_v15 = vadd.f32 %v1141_v52, %v704_v10  ;;  %vm723_vm15 = vmor %vm721_vm14, %vm722_vm13  ;;  %v757_v43 = vand.u32 2147483648, %v1708_v8 }
 0x194   : > { %1152 = vrcp.f32 %v1708_v8  ;;  %v679_v19 = vsel %vm678_vm10, %v1139_v48, %v675_v12  ;;  %v718_v22 = vsub.f32 1.0, %v717_v23  ;;  %v735_v48 = vadd.f32 %v1697_v57, %v734_v37 }
 0x195   : > { %1154 = vrcp.f32 %v1714_v14  ;;  %v684_v26 = vsel %vm1701_vm6, %v683_v13, %v679_v19  ;;  %v709_v40 = vsel %vm708_vm12, %v1141_v52, %v705_v15  ;;  %v755_v50 = vand.u32 2147483647, %v1708_v8 }
 0x196   : > { %793 = vperm.xlu2 %1123, %v684_v26   ;;  %v714_v18 = vsel %vm711_vm11, %v713_v20, %v709_v40  ;;  %v719_v29 = vmul.f32 %v1147_v7, %v718_v22  ;;  %v742_v52 = vand.u32 2147483648, %v1679_v16  ;;  %vm751_vm5 = vweird.f32 %v1708_v8  ;;  %v1158_v22 = vld [vmem:[%s1437_s25] sm:$0xff]  ;;  %v1160_v40 = vld [vmem:[%s1437_s25 + $0x10] sm:$0xff] }
 0x197   : > { %803 = vperm.xlu1 %1125, %v714_v18   ;;  %v739_v58 = vsel %vm1735_vm4, %v1697_v57, %v735_v48  ;;  %v758_v61 = vor.u32 1.1754944e-38, %v757_v43  ;;  %vm756_vm7 = vcmp.eq.f32.partialorder %v755_v50, 8.507059e+37  ;;  %vm766_vm11 = vweird.f32 %v1714_v14  ;;  %v1161_v18 = vld [vmem:[%s1437_s25 + $0x18] sm:$0xff] }
 0x198   : > { %v720_v33 = vadd.f32 %v1147_v7, %v719_v29  ;;  %v743_v0 = vor.u32 1.1754944e-38, %v742_v52  ;;  %v772_v57 = vand.u32 2147483648, %v1714_v14  ;;  %v770_v6 = vand.u32 2147483647, %v1714_v14 }
 0x199   : > { %v1151_v24 = vpop.eup %1150 }
 0x19a   : > { %v1153_v34 = vpop.eup %1152  ;;  %v670_v35 = vadd.f32 1.0, %v1151_v24  ;;  %v724_v38 = vsel %vm723_vm15, %v1147_v7, %v720_v33  ;;  %v744_v16 = vsel %vm741_vm8, %v743_v0, %v739_v58  ;;  %v773_v15 = vor.u32 1.1754944e-38, %v772_v57  ;;  %v1163_v33 = vld [vmem:[%s1437_s25 + $0x28] sm:$0xff]  ;;  %v1175_v0 = vld [vmem:[%s1437_s25 + $0x120] sm:$0xff] }
 0x19b   : > { %v747_v39 = vmul.f32 %v1153_v34, %v1708_v8  ;;  %v1155_v41 = vpop.eup %1154  ;;  %v729_v44 = vsel %vm726_vm0, %v728_v9, %v724_v38  ;;  %vm752_vm2 = vweird.f32 %v1153_v34  ;;  %vm771_vm0 = vcmp.eq.f32.partialorder %v770_v6, 8.507059e+37 }
 0x19c   : > { %1156 = vrcp.f32 %v670_v35  ;;  %v762_v46 = vmul.f32 %v1155_v41, %v1714_v14  ;;  %vm753_vm6 = vmor %vm751_vm5, %vm752_vm2  ;;  %v787_v3 = vand.u32 2147483648, %v670_v35  ;;  %vm767_vm9 = vweird.f32 %v1155_v41 }
 0x19d   : > { %v748_v45 = vsub.f32 1.0, %v747_v39  ;;  %v785_v7 = vand.u32 2147483647, %v670_v35  ;;  %vm781_vm12 = vweird.f32 %v670_v35  ;;  %vm768_vm13 = vmor %vm766_vm11, %vm767_vm9  ;;  %v1165_v39 = vld [vmem:[%s1437_s25 + $0xc0] sm:$0xff] }
 0x19e   : > { %808 = vperm.xlu2 %1123, %v729_v44   ;;  %v763_v51 = vsub.f32 1.0, %v762_v46  ;;  %v788_v11 = vor.u32 1.1754944e-38, %v787_v3  ;;  %v1166_v44 = vld [vmem:[%s1437_s25 + $0xc8] sm:$0xff]  ;;  %v1167_v46 = vld [vmem:[%s1437_s25 + $0xd0] sm:$0xff] }
 0x19f   : > { %v749_v49 = vmul.f32 %v1153_v34, %v748_v45  ;;  %vm786_vm15 = vcmp.eq.f32.partialorder %v785_v7, 8.507059e+37  ;;  %v1176_v7 = vld [vmem:[%s1437_s25 + $0x40] sm:$0xff] }
 0x1a0   : > { %v764_v17 = vmul.f32 %v1155_v41, %v763_v51  ;;  %v1170_v51 = vld [vmem:[%s1437_s25 + $0xe8] sm:$0xff] }
 0x1a1   : > { %v750_v55 = vadd.f32 %v1153_v34, %v749_v49  ;;  %v1169_v49 = vld [vmem:[%s1437_s25 + $0xe0] sm:$0xff] }
 0x1a2   : > { %v1157_v56 = vpop.eup %1156  ;;  %v765_v8 = vadd.f32 %v1155_v41, %v764_v17 }
 0x1a3   : > { %v754_v62 = vsel %vm753_vm6, %v1153_v34, %v750_v55  ;;  %v777_v63 = vmul.f32 %v1157_v56, %v670_v35  ;;  %vm782_vm10 = vweird.f32 %v1157_v56  ;;  %v1164_v35 = vld [vmem:[%s1437_s25 + $0x30] sm:$0xff] }
 0x1a4   : > { %v759_v1 = vsel %vm756_vm7, %v758_v61, %v754_v62  ;;  %vm783_vm14 = vmor %vm781_vm12, %vm782_vm10  ;;  %v769_v13 = vsel %vm768_vm13, %v1155_v41, %v765_v8  ;;  %v1172_v61 = vld [vmem:[%s1437_s25 + $0x108] sm:$0xff] }
 0x1a5   : > { %818 = vperm.xlu1 %1125, %v759_v1   ;;  %v778_v2 = vsub.f32 1.0, %v777_v63  ;;  %v774_v19 = vsel %vm771_vm0, %v773_v15, %v769_v13  ;;  %v1173_v63 = vld [vmem:[%s1437_s25 + $0x110] sm:$0xff]  ;;  %v1181_v13 = vld [vmem:[%s1437_s25 + $0x68] sm:$0xff] }
 0x1a6   : > { %813 = vperm.xlu2 %1123, %v744_v16  }
 0x1a7   : > { %v779_v5 = vmul.f32 %v1157_v56, %v778_v2 }
 0x1a9   : > { %v780_v10 = vadd.f32 %v1157_v56, %v779_v5 }
 0x1ab   : > { %v784_v12 = vsel %vm783_vm14, %v1157_v56, %v780_v10  ;;  %v1171_v56 = vld [vmem:[%s1437_s25 + $0x100] sm:$0xff]  ;;  %v1178_v10 = vld [vmem:[%s1437_s25 + $0x50] sm:$0xff] }
 0x1ac   : > { %v789_v23 = vsel %vm786_vm15, %v788_v11, %v784_v12  ;;  %v1180_v11 = vld [vmem:[%s1437_s25 + $0x60] sm:$0xff] }
 0x1ad   : > { %828 = vperm.xlu1 %1125, %v789_v23  }
 0x1ae   : > { %823 = vperm.xlu2 %1123, %v774_v19   ;;  %v1182_v19 = vld [vmem:[%s1437_s25 + $0x70] sm:$0xff] }
 0x1f0   : > { %v794_v20 = vpop.permute.xlu2 %793 }
 0x1f1   : > { %v831_v14 = vmul.f32 %v1158_v22, %v794_v20  ;;  %v832_v26 = vmul.f32 %v1159_v25, %v794_v20  ;;  %v833_v28 = vmul.f32 %v1160_v40, %v794_v20  ;;  %v834_v29 = vmul.f32 %v1161_v18, %v794_v20  ;;  %v1183_v22 = vld [vmem:[%s1437_s25 + $0x78] sm:$0xff]  ;;  %v1184_v25 = vld [vmem:[%s1437_s25 + $0x80] sm:$0xff]  ;;  %v1185_v40 = vld [vmem:[%s1437_s25 + $0x88] sm:$0xff] }
 0x1f2   : > { %v835_v24 = vmul.f32 %v1162_v30, %v794_v20  ;;  %v836_v34 = vmul.f32 %v1163_v33, %v794_v20  ;;  %v837_v9 = vmul.f32 %v1164_v35, %v794_v20  ;;  %v838_v37 = vmul.f32 %v794_v20, %v1488_v60  ;;  %v1168_v60 = vld [vmem:[%s1437_s25 + $0xd8] sm:$0xff]  ;;  %v1186_v18 = vld [vmem:[%s1437_s25 + $0x90] sm:$0xff]  ;;  %v1188_v33 = vld [vmem:[%s1437_s25 + $0xa0] sm:$0xff] }
 0x1f3   : > { %895 = vst [vmem:[%s1754_s11] sm:$0xff] %v831_v14  ;;  %v1187_v30 = vld [vmem:[%s1437_s25 + $0x98] sm:$0xff]  ;;  %v1189_v35 = vld [vmem:[%s1437_s25 + $0xa8] sm:$0xff] }
 0x1f4   : > { %896 = vst [vmem:[%s1754_s11 + $0x8] sm:$0xff] %v832_v26 }
 0x1f5   : > { %897 = vst [vmem:[%s1754_s11 + $0x10] sm:$0xff] %v833_v28 }
 0x1f6   : > { %898 = vst [vmem:[%s1754_s11 + $0x18] sm:$0xff] %v834_v29 }
 0x1f7   : > { %899 = vst [vmem:[%s1754_s11 + $0x20] sm:$0xff] %v835_v24 }
 0x1f8   : > { %900 = vst [vmem:[%s1754_s11 + $0x28] sm:$0xff] %v836_v34  ;;  %v809_v38 = vpop.permute.xlu2 %808 }
 0x1f9   : > { %901 = vst [vmem:[%s1754_s11 + $0x30] sm:$0xff] %v837_v9  ;;  %v855_v41 = vmul.f32 %v1165_v39, %v809_v38  ;;  %v856_v45 = vmul.f32 %v1166_v44, %v809_v38  ;;  %v857_v48 = vmul.f32 %v1167_v46, %v809_v38  ;;  %v858_v43 = vmul.f32 %v1168_v60, %v809_v38 }
 0x1fa   : > { %902 = vst [vmem:[%s1754_s11 + $0x38] sm:$0xff] %v838_v37  ;;  %v859_v50 = vmul.f32 %v1169_v49, %v809_v38  ;;  %v860_v52 = vmul.f32 %v1170_v51, %v809_v38  ;;  %v861_v53 = vmul.f32 %v809_v38, %v1504_v21  ;;  %v862_v54 = vmul.f32 %v809_v38, %v1526_v47  ;;  %v1174_v47 = vld [vmem:[%s1437_s25 + $0x118] sm:$0xff]  ;;  %v1190_v38 = vld [vmem:[%s1437_s25 + $0xb0] sm:$0xff] }
 0x1fb   : > { %919 = vst [vmem:[%s1754_s11 + $0xc0] sm:$0xff] %v855_v41  ;;  %v1191_v41 = vld [vmem:[%s1437_s25 + $0xb8] sm:$0xff] }
 0x1fc   : > { %920 = vst [vmem:[%s1754_s11 + $0xc8] sm:$0xff] %v856_v45  ;;  %v1192_v45 = vld [vmem:[%s1437_s25 + $0x180] sm:$0xff] }
 0x1fd   : > { %921 = vst [vmem:[%s1754_s11 + $0xd0] sm:$0xff] %v857_v48  ;;  %v1193_v48 = vld [vmem:[%s1437_s25 + $0x188] sm:$0xff] }
 0x1fe   : > { %922 = vst [vmem:[%s1754_s11 + $0xd8] sm:$0xff] %v858_v43  ;;  %v799_v16 = vpop.permute.xlu0 %798  ;;  %v1194_v43 = vld [vmem:[%s1437_s25 + $0x190] sm:$0xff] }
 0x1ff   : > { %923 = vst [vmem:[%s1754_s11 + $0xe0] sm:$0xff] %v859_v50  ;;  %v839_v8 = vmul.f32 %v1176_v7, %v799_v16  ;;  %v843_v12 = vmul.f32 %v1180_v11, %v799_v16  ;;  %v844_v23 = vmul.f32 %v1181_v13, %v799_v16  ;;  %v845_v20 = vmul.f32 %v1182_v19, %v799_v16  ;;  %v1195_v50 = vld [vmem:[%s1437_s25 + $0x198] sm:$0xff]  ;;  %v1208_v11 = vld [vmem:[%s1437_s25 + $0x1e0] sm:$0xff]  ;;  %v1209_v13 = vld [vmem:[%s1437_s25 + $0x1e8] sm:$0xff] }
 0x200   : > { %924 = vst [vmem:[%s1754_s11 + $0xe8] sm:$0xff] %v860_v52  ;;  %v814_v55 = vpop.permute.xlu2 %813  ;;  %v846_v14 = vmul.f32 %v1183_v22, %v799_v16 }
 0x201   : > { %925 = vst [vmem:[%s1754_s11 + $0xf0] sm:$0xff] %v861_v53  ;;  %v863_v58 = vmul.f32 %v1171_v56, %v814_v55  ;;  %v864_v62 = vmul.f32 %v1172_v61, %v814_v55  ;;  %v865_v21 = vmul.f32 %v1173_v63, %v814_v55  ;;  %v866_v17 = vmul.f32 %v1174_v47, %v814_v55  ;;  %v1196_v53 = vld [vmem:[%s1437_s25 + $0x1a0] sm:$0xff]  ;;  %v1198_v63 = vld [vmem:[%s1437_s25 + $0x148] sm:$0xff] }
 0x202   : > { %926 = vst [vmem:[%s1754_s11 + $0xf8] sm:$0xff] %v862_v54  ;;  %v867_v1 = vmul.f32 %v1175_v0, %v814_v55  ;;  %v868_v2 = vmul.f32 %v814_v55, %v1511_v31  ;;  %v869_v3 = vmul.f32 %v814_v55, %v1521_v42  ;;  %v870_v5 = vmul.f32 %v814_v55, %v1535_v59  ;;  %v1177_v31 = vld [vmem:[%s1437_s25 + $0x48] sm:$0xff]  ;;  %v1179_v59 = vld [vmem:[%s1437_s25 + $0x58] sm:$0xff]  ;;  %v1197_v61 = vld [vmem:[%s1437_s25 + $0x140] sm:$0xff] }
 0x203   : > { %927 = vst [vmem:[%s1754_s11 + $0x100] sm:$0xff] %v863_v58  ;;  %v840_v57 = vmul.f32 %v1177_v31, %v799_v16  ;;  %v841_v42 = vmul.f32 %v1178_v10, %v799_v16  ;;  %v842_v6 = vmul.f32 %v1179_v59, %v799_v16 }
 0x204   : > { %928 = vst [vmem:[%s1754_s11 + $0x108] sm:$0xff] %v864_v62 }
 0x205   : > { %929 = vst [vmem:[%s1754_s11 + $0x110] sm:$0xff] %v865_v21 }
 0x206   : > { %930 = vst [vmem:[%s1754_s11 + $0x118] sm:$0xff] %v866_v17  ;;  %v1201_v17 = vld [vmem:[%s1437_s25 + $0x160] sm:$0xff] }
 0x207   : > { %931 = vst [vmem:[%s1754_s11 + $0x120] sm:$0xff] %v867_v1  ;;  %v1202_v1 = vld [vmem:[%s1437_s25 + $0x168] sm:$0xff] }
 0x208   : > { %932 = vst [vmem:[%s1754_s11 + $0x128] sm:$0xff] %v868_v2  ;;  %v824_v37 = vpop.permute.xlu2 %823 }
 0x209   : > { %933 = vst [vmem:[%s1754_s11 + $0x130] sm:$0xff] %v869_v3  ;;  %v804_v15 = vpop.permute.xlu1 %803  ;;  %v879_v46 = vmul.f32 %v1192_v45, %v824_v37  ;;  %v880_v60 = vmul.f32 %v1193_v48, %v824_v37  ;;  %v881_v49 = vmul.f32 %v1194_v43, %v824_v37  ;;  %v882_v51 = vmul.f32 %v1195_v50, %v824_v37  ;;  %v1203_v3 = vld [vmem:[%s1437_s25 + $0x170] sm:$0xff] }
 0x20a   : > { %934 = vst [vmem:[%s1754_s11 + $0x138] sm:$0xff] %v870_v5  ;;  %v847_v26 = vmul.f32 %v1184_v25, %v804_v15  ;;  %v848_v28 = vmul.f32 %v1185_v40, %v804_v15  ;;  %v849_v29 = vmul.f32 %v1186_v18, %v804_v15  ;;  %v850_v24 = vmul.f32 %v1187_v30, %v804_v15 }
 0x20b   : > { %903 = vst [vmem:[%s1754_s11 + $0x40] sm:$0xff] %v839_v8  ;;  %v851_v34 = vmul.f32 %v1188_v33, %v804_v15  ;;  %v852_v9 = vmul.f32 %v1189_v35, %v804_v15  ;;  %v853_v39 = vmul.f32 %v1190_v38, %v804_v15  ;;  %v854_v44 = vmul.f32 %v1191_v41, %v804_v15  ;;  %v1204_v8 = vld [vmem:[%s1437_s25 + $0x1c0] sm:$0xff]  ;;  %v1210_v15 = vld [vmem:[%s1437_s25 + $0x1f0] sm:$0xff] }
 0x20c   : > { %904 = vst [vmem:[%s1754_s11 + $0x48] sm:$0xff] %v840_v57  ;;  %v883_v54 = vmul.f32 %v1196_v53, %v824_v37  ;;  %v884_v55 = vmul.f32 %v824_v37, %v1547_v4  ;;  %v885_v56 = vmul.f32 %v824_v37, %v1557_v27  ;;  %v886_v58 = vmul.f32 %v824_v37, %v1566_v36  ;;  %v1199_v4 = vld [vmem:[%s1437_s25 + $0x150] sm:$0xff]  ;;  %v1200_v36 = vld [vmem:[%s1437_s25 + $0x158] sm:$0xff]  ;;  %v1205_v57 = vld [vmem:[%s1437_s25 + $0x1c8] sm:$0xff] }
 0x20d   : > { %905 = vst [vmem:[%s1754_s11 + $0x50] sm:$0xff] %v841_v42  ;;  %v1206_v42 = vld [vmem:[%s1437_s25 + $0x1d0] sm:$0xff] }
 0x20e   : > { %906 = vst [vmem:[%s1754_s11 + $0x58] sm:$0xff] %v842_v6 }
 0x20f   : > { %907 = vst [vmem:[%s1754_s11 + $0x60] sm:$0xff] %v843_v12 }
 0x210   : > { %908 = vst [vmem:[%s1754_s11 + $0x68] sm:$0xff] %v844_v23 }
 0x211   : > { %909 = vst [vmem:[%s1754_s11 + $0x70] sm:$0xff] %v845_v20  ;;  %v1211_v20 = vld [vmem:[%s1437_s25 + $0x1f8] sm:$0xff] }
 0x212   : > { %910 = vst [vmem:[%s1754_s11 + $0x78] sm:$0xff] %v846_v14 }
 0x213   : > { %911 = vst [vmem:[%s1754_s11 + $0x80] sm:$0xff] %v847_v26 }
 0x214   : > { %912 = vst [vmem:[%s1754_s11 + $0x88] sm:$0xff] %v848_v28 }
 0x215   : > { %913 = vst [vmem:[%s1754_s11 + $0x90] sm:$0xff] %v849_v29 }
 0x216   : > { %914 = vst [vmem:[%s1754_s11 + $0x98] sm:$0xff] %v850_v24 }
 0x217   : > { %915 = vst [vmem:[%s1754_s11 + $0xa0] sm:$0xff] %v851_v34  ;;  %v819_v52 = vpop.permute.xlu1 %818 }
 0x218   : > { %916 = vst [vmem:[%s1754_s11 + $0xa8] sm:$0xff] %v852_v9  ;;  %v871_v62 = vmul.f32 %v1197_v61, %v819_v52  ;;  %v872_v21 = vmul.f32 %v1198_v63, %v819_v52  ;;  %v873_v27 = vmul.f32 %v1199_v4, %v819_v52  ;;  %v874_v47 = vmul.f32 %v1200_v36, %v819_v52 }
 0x219   : > { %917 = vst [vmem:[%s1754_s11 + $0xb0] sm:$0xff] %v853_v39  ;;  %v875_v0 = vmul.f32 %v1201_v17, %v819_v52  ;;  %v876_v2 = vmul.f32 %v1202_v1, %v819_v52  ;;  %v877_v5 = vmul.f32 %v1203_v3, %v819_v52  ;;  %v878_v7 = vmul.f32 %v819_v52, %v1561_v32  ;;  %v1207_v32 = vld [vmem:[%s1437_s25 + $0x1d8] sm:$0xff]  ;;  %s1262_s25 = scalar_lea.hbm %s1918_s5, 1024 }
 0x21a   : > { %918 = vst [vmem:[%s1754_s11 + $0xb8] sm:$0xff] %v854_v44  ;;  %p1264_p1 = scmp.lt.s32.totalorder %s1262_s25, %s1258_s26 }
 0x21b   : > { %943 = vst [vmem:[%s1754_s11 + $0x180] sm:$0xff] %v879_v46 }
 0x21c   : > { %944 = vst [vmem:[%s1754_s11 + $0x188] sm:$0xff] %v880_v60  ;;  %p1265_p3 = por %p1264_p1, %p1263_p0 }
 0x21d   : > { %945 = vst [vmem:[%s1754_s11 + $0x190] sm:$0xff] %v881_v49 }
 0x21e   : > { %946 = vst [vmem:[%s1754_s11 + $0x198] sm:$0xff] %v882_v51  ;;  %p1266_p4 = pnand %p1265_p3, %p1261_p13 }
 0x21f   : > { %947 = vst [vmem:[%s1754_s11 + $0x1a0] sm:$0xff] %v883_v54  ;;  %v829_v16 = vpop.permute.xlu1 %828 }
 0x220   : > { %948 = vst [vmem:[%s1754_s11 + $0x1a8] sm:$0xff] %v884_v55  ;;  %v887_v31 = vmul.f32 %v1204_v8, %v829_v16  ;;  %v888_v10 = vmul.f32 %v1205_v57, %v829_v16  ;;  %v889_v59 = vmul.f32 %v1206_v42, %v829_v16  ;;  %v890_v6 = vmul.f32 %v1207_v32, %v829_v16 }
 0x221   : > { %949 = vst [vmem:[%s1754_s11 + $0x1b0] sm:$0xff] %v885_v56  ;;  %v891_v12 = vmul.f32 %v1208_v11, %v829_v16  ;;  %v892_v23 = vmul.f32 %v1209_v13, %v829_v16  ;;  %v893_v19 = vmul.f32 %v1210_v15, %v829_v16  ;;  %v894_v22 = vmul.f32 %v1211_v20, %v829_v16 }
 0x222   : > { %950 = vst [vmem:[%s1754_s11 + $0x1b8] sm:$0xff] %v886_v58 }
 0x223   : > { %935 = vst [vmem:[%s1754_s11 + $0x140] sm:$0xff] %v871_v62 }
 0x224   : > { %936 = vst [vmem:[%s1754_s11 + $0x148] sm:$0xff] %v872_v21 }
 0x225   : > { %937 = vst [vmem:[%s1754_s11 + $0x150] sm:$0xff] %v873_v27 }
 0x226   : > { %938 = vst [vmem:[%s1754_s11 + $0x158] sm:$0xff] %v874_v47 }
 0x227   : > { %939 = vst [vmem:[%s1754_s11 + $0x160] sm:$0xff] %v875_v0 }
 0x228   : > { %940 = vst [vmem:[%s1754_s11 + $0x168] sm:$0xff] %v876_v2 }
 0x229   : > { %941 = vst [vmem:[%s1754_s11 + $0x170] sm:$0xff] %v877_v5 }
 0x22a   : > { %942 = vst [vmem:[%s1754_s11 + $0x178] sm:$0xff] %v878_v7 }
 0x22b   : > { %951 = vst [vmem:[%s1754_s11 + $0x1c0] sm:$0xff] %v887_v31 }
 0x22c   : > { %952 = vst [vmem:[%s1754_s11 + $0x1c8] sm:$0xff] %v888_v10 }
 0x22d   : > { %953 = vst [vmem:[%s1754_s11 + $0x1d0] sm:$0xff] %v889_v59 }
 0x22e   : > { %954 = vst [vmem:[%s1754_s11 + $0x1d8] sm:$0xff] %v890_v6 }
 0x22f   : > { %955 = vst [vmem:[%s1754_s11 + $0x1e0] sm:$0xff] %v891_v12 }
 0x230   : > { %956 = vst [vmem:[%s1754_s11 + $0x1e8] sm:$0xff] %v892_v23 }
 0x231   : > { %957 = vst [vmem:[%s1754_s11 + $0x1f0] sm:$0xff] %v893_v19 }
 0x232   : > { %958 = vst [vmem:[%s1754_s11 + $0x1f8] sm:$0xff] %v894_v22 }
 0x233   : > { %1269 = shalt.err (!%p1266_p4)
}
 0x234   : > { %s1313_s12 = smov 1024   ;;  %s1314_s7 = smov 64  }
 0x235   : > { %1074 = dma.vmem_to_hbm [thread:$0]  (%p1395_p11), %s973_s13, 8192, %s975_s15, %s960_s16, %s1313_s12, %s1313_s12, %s1314_s7  }
 0x236 PF: > { %s989_s11 = sand.u32 1, %s1296_s18   ;;  %p1928_p7 = scmp.ge.s32.totalorder %s1308_s21, 2 }
 0x237   : > { %s990_s14 = scalar_lea.sflag [#allocation4], %s989_s11 }
 0x238   : > { %p1081_p5 = pnand %p1928_p7, %p1399_p12 }
 0x23a   : > { %p1082_p8 = pneg %p1081_p5 }
 0x23c   : > { %1291 = dma.done.wait (%p1082_p8), %s990_s14, 8192  }
 0x23d   : > { %1293 = vsyncadd (%p1082_p8), %s990_s14, 4294959104  ;;  %p18_p10 = scmp.ge.s32.totalorder %s1370_s24, 4   ;;  %s1929_s18 = smov %s1300_s19 }
 0x23e   : > { %s1930_s19 = smov %s1304_s20  ;;  %s1931_s20 = smov %s1382_s27 }
 0x23f   : > { %s1932_s21 = smov %s1370_s24  ;;  %20 = sbr.rel (!%p18_p10) target bundleno = 5 (0x5), region = 85 }
 0x244   :  { %996 = vsyncpa [#allocation3], 1 }
 0x245   :  { %998 = vsyncpa [#allocation3 + $0x1], 1 }
 0x246   :  { %999 = vsyncpa [#allocation4], 1 }
 0x247   :  { %1001 = vsyncpa [#allocation4 + $0x1], 1 }

</bundles_post_ra>
